<compile_context>
chip_gen: v5e
topology: v5e:2x2
jax: 0.10.0
libtpu: 0.0.40
codegen_flags: <defaults>
</compile_context>

<pallas_src>
import functools
import math

import jax
import jax.numpy as jnp
import numpy as np
from jax.experimental import pallas as pl
from jax.experimental.pallas import tpu as pltpu


# ----------------------------------------------------------------------------
# helpers
# ----------------------------------------------------------------------------
def _round_up(x, m):
    return ((x + m - 1) // m) * m


def _freq_phase(embedding_dim, div_half_dim):
    """Per-lane inverse frequency and phase (0 for sin lanes, pi/2 for cos lanes)."""
    assert embedding_dim % 2 == 0, "embedding_dim must be even"
    half = embedding_dim // 2
    if not div_half_dim:
        assert half > 1, "embedding_dim must be >= 4 when div_half_dim=False"
        scale = math.log(10000.0) / (half - 1)
    else:
        scale = math.log(10000.0) / half
    f = np.exp(np.arange(half, dtype=np.float32) * np.float32(-scale))
    inv_freq = np.concatenate([f, f]).astype(np.float32)                 # (E,)
    phase = np.concatenate([np.zeros(half, np.float32),
                            np.full(half, np.pi / 2.0, np.float32)])     # (E,)
    return jnp.asarray(inv_freq), jnp.asarray(phase)


def _make_positions(ids, padding_idx):
    """fairseq make_positions, computed in the XLA wrapper (tiny int cumsum).

    Exact in int32; positions are later used as f32 (exact up to 2^24)."""
    mask = (ids != padding_idx).astype(jnp.int32)
    return jnp.cumsum(mask, axis=1) * mask + padding_idx


def _pick_lane_tile(hw, e, out_bytes=4, max_block_bytes=4 << 20):
    """Largest divisor of hw that is a multiple of 128 and keeps a (2,E,tile)
    output block under max_block_bytes; fall back to the full extent."""
    if 2 * e * hw * out_bytes <= max_block_bytes or hw % 128 != 0:
        return hw
    best = None
    d = 128
    while d < hw:
        if hw % d == 0 and 2 * e * d * out_bytes <= max_block_bytes:
            best = d
        d += 128
    return best if best is not None else hw


# ----------------------------------------------------------------------------
# Pallas kernel: 1D path. rows = b*seq on sublanes, embedding_dim on lanes.
# ----------------------------------------------------------------------------
def _spe1d_kernel(pos_ref, invf_ref, phase_ref, o_ref, *, padding_idx):
    # pos_ref  : (TR, 1) int32  -- precomputed positions (padding rows == padding_idx)
    # invf_ref : (1, E)  f32
    # phase_ref: (1, E)  f32    -- 0 for sin lanes, pi/2 for cos lanes
    # o_ref    : (TR, E)
    pos = pos_ref[...]                                        # (TR, 1) int32
    not_pad = (pos != padding_idx).astype(jnp.float32)        # (TR, 1)
    ang = pos.astype(jnp.float32) * invf_ref[...] + phase_ref[...]   # (TR, E)
    o_ref[...] = (jnp.sin(ang) * not_pad).astype(o_ref.dtype)


def spe1d_pallas(ids, embedding_dim, padding_idx, div_half_dim=False,
                 out_dtype=jnp.float32):
    """1D SPE forward. ids: (b, seq) int -> (b, seq, embedding_dim)."""
    ids = jnp.asarray(ids, dtype=jnp.int32)
    B, S = ids.shape
    R = B * S
    E = embedding_dim

    inv_freq, phase = _freq_phase(E, div_half_dim)
    inv_freq = inv_freq.reshape(1, E)
    phase = phase.reshape(1, E)

    # positions computed in the wrapper (was an (R,R) matmul in-kernel before)
    pos_col = _make_positions(ids, padding_idx).reshape(R, 1)

    # Row tiling: big lane-dense tiles, padded rows carry padding_idx (-> zeros).
    TR = _round_up(min(R, 1024), 8)
    R_pad = _round_up(R, TR)
    if R_pad != R:
        pos_col = jnp.pad(pos_col, ((0, R_pad - R), (0, 0)),
                          constant_values=padding_idx)
    grid = (R_pad // TR,)

    out_bytes = jnp.dtype(out_dtype).itemsize
    out = pl.pallas_call(
        functools.partial(_spe1d_kernel, padding_idx=int(padding_idx)),
        out_shape=jax.ShapeDtypeStruct((R_pad, E), out_dtype),
        grid_spec=pltpu.PrefetchScalarGridSpec(
            num_scalar_prefetch=0,
            grid=grid,
            in_specs=[
                pl.BlockSpec((TR, 1), lambda i: (i, 0)),        # positions
                pl.BlockSpec((1, E), lambda i: (0, 0)),          # inv_freq
                pl.BlockSpec((1, E), lambda i: (0, 0)),          # phase
            ],
            out_specs=pl.BlockSpec((TR, E), lambda i: (i, 0)),
        ),
        compiler_params=pltpu.CompilerParams(
            dimension_semantics=("parallel",)),                  # v7x: 2 TCs
        cost_estimate=pl.CostEstimate(
            flops=3 * R_pad * E,
            transcendentals=R_pad * E,
            bytes_accessed=4 * R_pad + 8 * E + R_pad * E * out_bytes,
        ),
    )(pos_col, inv_freq, phase)
    return out[:R].reshape(B, S, E)


# ----------------------------------------------------------------------------
# Pallas kernel: fused 2D grid. Output slab (b, 2, E, h*w), h*w on lanes.
# ----------------------------------------------------------------------------
def _spe2d_grid_kernel(px_ref, py_ref, invf_ref, phase_ref, o_ref, *, padding_idx):
    # px_ref/py_ref : (1, 1, THW) int32 -- positions already expanded to the
    #                 flattened spatial index s = i*w + j (x: per-column, y: per-row)
    # invf_ref/phase_ref : (E, 1) f32
    # o_ref         : (1, 2, E, THW)    -- channel 0 = x half, channel 1 = y half
    px = px_ref[0]                                            # (1, THW)
    py = py_ref[0]
    invf = invf_ref[...]                                      # (E, 1)
    ph = phase_ref[...]                                       # (E, 1)
    mx = (px != padding_idx).astype(jnp.float32)              # (1, THW)
    my = (py != padding_idx).astype(jnp.float32)
    ang_x = px.astype(jnp.float32) * invf + ph                # (E, THW)
    ang_y = py.astype(jnp.float32) * invf + ph
    o_ref[0, 0] = (jnp.sin(ang_x) * mx).astype(o_ref.dtype)
    o_ref[0, 1] = (jnp.sin(ang_y) * my).astype(o_ref.dtype)


# ----------------------------------------------------------------------------
# Module-like wrapper mirroring the PyTorch API.
# ----------------------------------------------------------------------------
class SinusoidalPositionalEmbeddingPallas:
    def __init__(self, embedding_dim, padding_idx, init_size=1024,
                 div_half_dim=False, center_shift=None):
        assert embedding_dim % 2 == 0
        if not div_half_dim:
            assert embedding_dim >= 4, \
                "embedding_dim must be >= 4 when div_half_dim=False (log/(d/2-1))"
        self.embedding_dim = embedding_dim
        self.padding_idx = padding_idx
        self.div_half_dim = div_half_dim
        self.center_shift = center_shift
        # Embeddings are computed on the fly per position (exactly the table
        # values), so no init_size-limited buffer is needed.
        # TODO(synk): the torch module rebuilds its table with the *default*
        # div_half_dim=False when seq_len + padding_idx + 1 > init_size; here we
        # always honor the configured div_half_dim.

    def __call__(self, x, **kwargs):
        x = jnp.asarray(x)
        if x.ndim == 2:
            return spe1d_pallas(x, self.embedding_dim, self.padding_idx,
                                self.div_half_dim)
        elif x.ndim == 4:
            return self.make_grid2d_like(x, **kwargs)
        else:
            raise ValueError("Input dimension should be 2 (1D) or 4 (2D)")

    def make_grid2d(self, height, width, num_batches=1, center_shift=None,
                    dtype=jnp.float32):
        h, w = int(height), int(width)
        if center_shift is None:
            center_shift = self.center_shift
        h_shift = 0
        w_shift = 0
        if center_shift is not None:
            h_shift = center_shift - (h // 2 if h % 2 == 0 else h // 2 + 1)
            w_shift = center_shift - (w // 2 if w % 2 == 0 else w // 2 + 1)

        nb = num_batches
        E = self.embedding_dim
        HW = h * w

        x_axis = jnp.tile(jnp.arange(1, w + 1, dtype=jnp.int32)[None, :],
                          (nb, 1)) + w_shift                          # (nb, w)
        y_axis = jnp.tile(jnp.arange(1, h + 1, dtype=jnp.int32)[None, :],
                          (nb, 1)) + h_shift                          # (nb, h)
        pos_x = _make_positions(x_axis, self.padding_idx)             # (nb, w)
        pos_y = _make_positions(y_axis, self.padding_idx)             # (nb, h)

        # Expand positions to the flattened spatial index s = i*w + j (tiny int
        # arrays, handled by XLA); the heavy (b,2E,h,w)-sized work stays fused
        # in one lane-dense Pallas kernel below.
        px = jnp.tile(pos_x, (1, h)).reshape(nb, 1, HW)               # pos_x[j]
        py = jnp.repeat(pos_y, w, axis=1).reshape(nb, 1, HW)          # pos_y[i]

        inv_freq, phase = _freq_phase(E, self.div_half_dim)
        invf_col = inv_freq.reshape(E, 1)
        phase_col = phase.reshape(E, 1)

        out_dtype = dtype if jnp.issubdtype(jnp.dtype(dtype), jnp.floating) \
            else jnp.float32
        out_bytes = jnp.dtype(out_dtype).itemsize

        t_hw = _pick_lane_tile(HW, E, out_bytes=out_bytes)
        grid = (nb, HW // t_hw)

        out = pl.pallas_call(
            functools.partial(_spe2d_grid_kernel,
                              padding_idx=int(self.padding_idx)),
            out_shape=jax.ShapeDtypeStruct((nb, 2, E, HW), out_dtype),
            grid_spec=pltpu.PrefetchScalarGridSpec(
                num_scalar_prefetch=0,
                grid=grid,
                in_specs=[
                    pl.BlockSpec((1, 1, t_hw), lambda b, s: (b, 0, s)),   # pos_x
                    pl.BlockSpec((1, 1, t_hw), lambda b, s: (b, 0, s)),   # pos_y
                    pl.BlockSpec((E, 1), lambda b, s: (0, 0)),            # inv_freq
                    pl.BlockSpec((E, 1), lambda b, s: (0, 0)),            # phase
                ],
                out_specs=pl.BlockSpec((1, 2, E, t_hw),
                                       lambda b, s: (b, 0, 0, s)),
            ),
            compiler_params=pltpu.CompilerParams(
                dimension_semantics=("parallel", "parallel")),
            cost_estimate=pl.CostEstimate(
                flops=6 * nb * E * HW,
                transcendentals=2 * nb * E * HW,
                bytes_accessed=2 * nb * HW * 4 + 2 * E * 4
                               + nb * 2 * E * HW * out_bytes,
            ),
        )(px, py, invf_col, phase_col)

        # (nb, 2, E, HW) -> (nb, 2E, h, w): contiguous split/merge, no data pass.
        return out.reshape(nb, 2 * E, h, w)

    def make_grid2d_like(self, x, center_shift=None):
        h, w = x.shape[-2], x.shape[-1]
        dtype = x.dtype if jnp.issubdtype(x.dtype, jnp.floating) else jnp.float32
        grid = self.make_grid2d(h, w, x.shape[0], center_shift, dtype=dtype)
        return grid.astype(x.dtype)


# ----------------------------------------------------------------------------
# Pure-numpy reference that mirrors the PyTorch code (table + index_select).
# ----------------------------------------------------------------------------
def _ref_get_embedding(num_embeddings, embedding_dim, padding_idx=None,
                       div_half_dim=False):
    half_dim = embedding_dim // 2
    if not div_half_dim:
        emb = np.log(10000) / (half_dim - 1)
    else:
        emb = np.log(10000.0) / half_dim
    emb = np.exp(np.arange(half_dim, dtype=np.float32) * -emb)
    emb = np.arange(num_embeddings, dtype=np.float32)[:, None] * emb[None, :]
    emb = np.concatenate([np.sin(emb), np.cos(emb)], axis=1).astype(np.float32)
    if padding_idx is not None:
        emb[padding_idx, :] = 0
    return emb


def _ref_forward_1d(ids, embedding_dim, padding_idx, div_half_dim=False,
                    init_size=1024):
    ids = np.asarray(ids)
    b, s = ids.shape
    max_pos = padding_idx + 1 + s
    table = _ref_get_embedding(max(init_size, max_pos), embedding_dim,
                               padding_idx, div_half_dim)
    mask = (ids != padding_idx).astype(np.int64)
    pos = np.cumsum(mask, axis=1) * mask + padding_idx
    return table[pos.reshape(-1)].reshape(b, s, embedding_dim)


def _ref_make_grid2d(h, w, nb, embedding_dim, padding_idx, div_half_dim=False,
                     center_shift=None):
    h_shift = 0
    w_shift = 0
    if center_shift is not None:
        h_shift = center_shift - (h // 2 if h % 2 == 0 else h // 2 + 1)
        w_shift = center_shift - (w // 2 if w % 2 == 0 else w // 2 + 1)
    x_axis = np.tile(np.arange(1, w + 1)[None, :], (nb, 1)) + w_shift
    y_axis = np.tile(np.arange(1, h + 1)[None, :], (nb, 1)) + h_shift
    x_emb = _ref_forward_1d(x_axis, embedding_dim, padding_idx,
                            div_half_dim).transpose(0, 2, 1)   # (b, E, w)
    y_emb = _ref_forward_1d(y_axis, embedding_dim, padding_idx,
                            div_half_dim).transpose(0, 2, 1)   # (b, E, h)
    x_grid = np.repeat(x_emb[:, :, None, :], h, axis=2)
    y_grid = np.repeat(y_emb[:, :, :, None], w, axis=3)
    return np.concatenate([x_grid, y_grid], axis=1)


if __name__ == "__main__":
    key = jax.random.PRNGKey(0)
    k1, k2 = jax.random.split(key)

    embedding_dim = 128      # lane-dense output (multiple of 128)
    padding_idx = 0

    spe = SinusoidalPositionalEmbeddingPallas(embedding_dim, padding_idx,
                                              init_size=1024)

    # ---- 1D path: (bsz, seq_len) token ids, 0 == padding ----
    ids = jax.random.randint(k1, (2, 8), 0, 5, dtype=jnp.int32)
    out1d = jax.block_until_ready(spe(ids))
    ref1d = _ref_forward_1d(np.asarray(ids), embedding_dim, padding_idx)
    assert out1d.shape == (2, 8, embedding_dim)
    assert np.allclose(np.asarray(out1d), ref1d, atol=1e-4, rtol=1e-4)

    # ---- 2D path: (b, c, h, w) feature map -> (b, 2*E, h, w) positional grid ----
    x = jax.random.normal(k2, (2, 4, 16, 16), dtype=jnp.float32)
    out2d = jax.block_until_ready(spe(x))
    ref2d = _ref_make_grid2d(16, 16, 2, embedding_dim, padding_idx)
    assert out2d.shape == (2, 2 * embedding_dim, 16, 16)
    assert np.allclose(np.asarray(out2d), ref2d, atol=1e-4, rtol=1e-4)

    print("KERNEL_OK")
</pallas_src>

<mosaic_0001>
module attributes {stable_mosaic.version = 11 : i64} {
  func.func @_spe1d_kernel(%arg0: i32, %arg1: memref<16x1xi32, #tpu.memory_space<vmem>>, %arg2: memref<1x128xf32, #tpu.memory_space<vmem>>, %arg3: memref<1x128xf32, #tpu.memory_space<vmem>>, %arg4: memref<16x128xf32, #tpu.memory_space<vmem>>) attributes {dimension_semantics = [#tpu.dimension_semantics<parallel>], iteration_bounds = array<i64: 1>, scalar_prefetch = 0 : i64, scratch_operands = 0 : i64, tpu.core_type = #tpu.core_type<tc>, window_params = [{transform_indices = @transform_0, window_bounds = array<i64: 16, 1>}, {pipeline_mode = #tpu.pipeline_mode<synchronous>, transform_indices = @transform_1, window_bounds = array<i64: 1, 128>}, {pipeline_mode = #tpu.pipeline_mode<synchronous>, transform_indices = @transform_2, window_bounds = array<i64: 1, 128>}, {transform_indices = @transform_3, window_bounds = array<i64: 16, 128>}]} {
    %c0 = arith.constant 0 : index
    %c0_0 = arith.constant 0 : index
    %0 = vector.load %arg1[%c0, %c0_0] : memref<16x1xi32, #tpu.memory_space<vmem>>, vector<16x1xi32>
    %c0_i32 = arith.constant 0 : i32
    %1 = vector.broadcast %c0_i32 : i32 to vector<16x1xi32>
    %2 = arith.cmpi ne, %0, %1 : vector<16x1xi32>
    %3 = arith.extui %2 : vector<16x1xi1> to vector<16x1xi32>
    %4 = arith.sitofp %3 : vector<16x1xi32> to vector<16x1xf32>
    %5 = arith.sitofp %0 : vector<16x1xi32> to vector<16x1xf32>
    %c0_1 = arith.constant 0 : index
    %c0_2 = arith.constant 0 : index
    %6 = vector.load %arg2[%c0_1, %c0_2] : memref<1x128xf32, #tpu.memory_space<vmem>>, vector<1x128xf32>
    %7 = vector.broadcast %5 : vector<16x1xf32> to vector<16x128xf32>
    %8 = vector.broadcast %6 : vector<1x128xf32> to vector<16x128xf32>
    %9 = arith.mulf %7, %8 : vector<16x128xf32>
    %c0_3 = arith.constant 0 : index
    %c0_4 = arith.constant 0 : index
    %10 = vector.load %arg3[%c0_3, %c0_4] : memref<1x128xf32, #tpu.memory_space<vmem>>, vector<1x128xf32>
    %11 = vector.broadcast %10 : vector<1x128xf32> to vector<16x128xf32>
    %12 = arith.addf %9, %11 : vector<16x128xf32>
    %13 = math.sin %12 : vector<16x128xf32>
    %14 = vector.broadcast %4 : vector<16x1xf32> to vector<16x128xf32>
    %15 = arith.mulf %13, %14 : vector<16x128xf32>
    %c0_5 = arith.constant 0 : index
    %c0_6 = arith.constant 0 : index
    %16 = vector.load %arg4[%c0_5, %c0_6] : memref<16x128xf32, #tpu.memory_space<vmem>>, vector<16x128xf32>
    tpu.vector_store %arg4[%c0_5, %c0_6], %15 {strides = array<i32>} : memref<16x128xf32, #tpu.memory_space<vmem>>, vector<16x128xf32>,
    return
  }
  func.func @transform_0(%arg0: i32) -> (i32, i32) {
    %c0_i32 = arith.constant 0 : i32
    %c0_i32_0 = arith.constant 0 : i32
    return %arg0, %c0_i32 : i32, i32
  }
  func.func @transform_1(%arg0: i32) -> (i32, i32) {
    %c0_i32 = arith.constant 0 : i32
    %c0_i32_0 = arith.constant 0 : i32
    %c0_i32_1 = arith.constant 0 : i32
    return %c0_i32, %c0_i32_0 : i32, i32
  }
  func.func @transform_2(%arg0: i32) -> (i32, i32) {
    %c0_i32 = arith.constant 0 : i32
    %c0_i32_0 = arith.constant 0 : i32
    %c0_i32_1 = arith.constant 0 : i32
    return %c0_i32, %c0_i32_0 : i32, i32
  }
  func.func @transform_3(%arg0: i32) -> (i32, i32) {
    %c0_i32 = arith.constant 0 : i32
    %c0_i32_0 = arith.constant 0 : i32
    return %arg0, %c0_i32 : i32, i32
  }
}

</mosaic_0001>

<bundles_post_ra>
// kernel: tpu_custom_call.1
= control target key start
LH: loop header
LB: loop body
LE: loop exit
PB: predicated region body
PF: predicated region fallthrough
CT: control target
= control target key end

     0   :  { %v443_v2 = vmov 0   ;;  %v444_v4 = vmov 0.0   ;;  %s664_s0 = inlined_call_operand.vmem [shape: s32[16,1], index: 0, kind: input, shape index: {}]   ;;  %s665_s1 = inlined_call_operand.vmem [shape: f32[1,128], index: 1, kind: input, shape index: {}]   ;;  %s666_s2 = inlined_call_operand.vmem [shape: f32[1,128], index: 2, kind: input, shape index: {}]   ;;  %s667_s3 = inlined_call_operand.hbm [shape: f32[16,128], index: 3, kind: output, shape index: {}]  }
   0x1   :  { %v15_v0 = vld [vmem:[%s664_s0] sm:$0xff]  ;;  %v16_v1 = vld [vmem:[%s664_s0 + $0x8] sm:$0xff]  ;;  %408 = vset.pattern.permute.xlu0 %v443_v2  ;;  %409 = vset.pattern.permute.xlu1 %v443_v2 }
   0x2   :  { %v23_v3 = vcvt.s32.f32 %v15_v0  ;;  %vm17_vm0 = vcmp.ne.s32.totalorder %v15_v0, 0  ;;  %vm18_vm1 = vcmp.ne.s32.totalorder %v16_v1, 0 }
   0x3   :  { %v389_v5 = vsel %vm17_vm0, 1.0, %v444_v4  ;;  %v390_v6 = vsel %vm18_vm1, 1.0, %v444_v4 }
   0x4   :  { %28 = vperm.xlu0 %408, %v23_v3   ;;  %v410_v7 = vpack.i.bf16 %v390_v6, %v389_v5 }
   0x5   :  { %8 = vsyncpa [#allocation3], 0  ;;  %v24_v8 = vcvt.s32.f32 %v16_v1  ;;  %v415_v9 = vld [vmem:[%s665_s1] ss:$0 sm:$0xff]  ;;  %v445_v33 = vmov 2102212464  }
   0x6   :  { %411 = vperm.xlu1 %409, %v410_v7   ;;  %v416_v10 = vld [vmem:[%s666_s2] ss:$0 sm:$0xff]  ;;  %v446_v35 = vmov 920167782   ;;  %v447_v38 = vmov 683565275  }
   0x7   :  { %v448_v41 = vmov 1326507024   ;;  %v449_v43 = vmov 2475754826   ;;  %v450_v47 = vmov 2131351028  }
   0x8   :  { %s451_s1 = smov [#allocation2]   ;;  %s377_s21 = sshll.u32 %s667_s3, 4  ;;  %s378_s21 = int_to_ptr.hbm [resolvable:$true] %s377_s21 }
   0x9   :  { %s375_s2 = sshll.u32 %s451_s1, 4  ;;  %s452_s22 = smov 128   ;;  %s376_s2 = int_to_ptr.vmem [resolvable:$true] %s375_s2 }
   0xa   :  { %s453_s23 = smov 8  }
   0xc   :  { %33 = vperm.xlu0 %408, %v24_v8  }
  0x76   :  { %v29_v11 = vpop.permute.xlu0 %28 }
  0x77   :  { %v39_v12 = vmul.f32 %v415_v9, %v29_v11 }
  0x79   :  { %v488_v13 = vadd.f32 %v416_v10, %v39_v12 }
  0x7b   :  { %v50_v14 = vand.u32 2139095040, %v488_v13  ;;  %v47_v15 = vand.u32 2147483647, %v488_v13 }
  0x7d   :  { %v51_v16 = vshrl.u32 %v50_v14, 23  ;;  %v54_v17 = vand.u32 8388607, %v47_v15 }
  0x7e   :  { %v34_v18 = vpop.permute.xlu0 %33 }
  0x7f   :  { %v391_v19 = vadd.s32 4294967169, %v51_v16  ;;  %v40_v20 = vmul.f32 %v415_v9, %v34_v18  ;;  %v55_v21 = vor.u32 8388608, %v54_v17 }
  0x81   :  { %v57_v22 = vadd.s32 1, %v391_v19  ;;  %v494_v23 = vadd.f32 %v416_v10, %v40_v20  ;;  %v497_v25 = vshll.u32 %v55_v21, 8 }
  0x83   :  { %vm58_vm2 = vcmp.gt.s32.totalorder %v57_v22, 0  ;;  %v205_v24 = vand.u32 2139095040, %v494_v23  ;;  %v502_v31 = vand.u32 65535, %v497_v25  ;;  %v202_v32 = vand.u32 2147483647, %v494_v23 }
  0x84   :  { %v59_v26 = vsel %vm58_vm2, %v57_v22, 0  ;;  %v97_v17 = vshrl.u32 %v497_v25, 16 }
  0x85   :  { %v61_v27 = vand.u32 31, %v59_v26  ;;  %v206_v28 = vshrl.u32 %v205_v24, 23  ;;  %v499_v29 = vshrl.u32 %v59_v26, 5  ;;  %v520_v3 = vand.u32 8388607, %v202_v32 }
  0x87   :  { %v62_v30 = vsub.s32 32, %v61_v27  ;;  %v73_v34 = vshll.u32 %v445_v33, %v61_v27  ;;  %v76_v36 = vshll.u32 %v446_v35, %v61_v27  ;;  %v394_v37 = vadd.s32 4294967169, %v206_v28 }
  0x88   :  { %v64_v39 = vshll.u32 %v447_v38, %v61_v27  ;;  %v67_v45 = vshll.u32 %v449_v43, %v61_v27  ;;  %v70_v49 = vshll.u32 %v450_v47, %v61_v27  ;;  %vm82_vm3 = vcmp.lt.s32.totalorder %v499_v29, 4 }
  0x89   :  { %v74_v40 = vshrl.u32 %v446_v35, %v62_v30  ;;  %v77_v42 = vshrl.u32 %v448_v41, %v62_v30  ;;  %v65_v44 = vshrl.u32 %v449_v43, %v62_v30  ;;  %v212_v46 = vadd.s32 1, %v394_v37 }
  0x8a   :  { %v68_v48 = vshrl.u32 %v450_v47, %v62_v30  ;;  %v71_v50 = vshrl.u32 %v445_v33, %v62_v30  ;;  %v63_v54 = vshrl.u32 %v447_v38, %v62_v30  ;;  %vm79_vm5 = vcmp.lt.s32.totalorder %v499_v29, 1 }
  0x8b   :  { %v75_v51 = vor.u32 %v74_v40, %v73_v34  ;;  %v78_v52 = vor.u32 %v77_v42, %v76_v36  ;;  %v66_v53 = vor.u32 %v65_v44, %v64_v39  ;;  %vm213_vm4 = vcmp.gt.s32.totalorder %v212_v46, 0 }
  0x8c   :  { %v69_v55 = vor.u32 %v68_v48, %v67_v45  ;;  %v72_v56 = vor.u32 %v71_v50, %v70_v49  ;;  %v214_v59 = vsel %vm213_vm4, %v212_v46, 0  ;;  %vm81_vm6 = vcmp.lt.s32.totalorder %v499_v29, 3 }
  0x8d   :  { %v88_v57 = vsel %vm82_vm3, %v75_v51, 920167782  ;;  %v92_v58 = vsel %vm82_vm3, %v78_v52, 1326507024  ;;  %v515_v60 = vand.u32 31, %v214_v59  ;;  %v522_v4 = vshrl.u32 %v214_v59, 5 }
  0x8e   :  { %v84_v61 = vsel %vm82_vm3, %v72_v56, 2102212464  ;;  %v87_v62 = vsel %vm79_vm5, %v66_v53, %v69_v55  ;;  %v89_v63 = vsel %vm81_vm6, %v72_v56, %v88_v57  ;;  %v91_v0 = vsel %vm79_vm5, %v69_v55, %v72_v56 }
  0x8f   :  { %v93_v1 = vsel %vm81_vm6, %v75_v51, %v92_v58  ;;  %v525_v5 = vsub.s32 32, %v515_v60  ;;  %vm80_vm7 = vcmp.lt.s32.totalorder %v499_v29, 2  ;;  %v83_v6 = vsel %vm79_vm5, %v63_v54, %v66_v53 }
  0x90   :  { %v231_v7 = vshll.u32 %v446_v35, %v515_v60  ;;  %v85_v8 = vsel %vm81_vm6, %v69_v55, %v84_v61  ;;  %v90_v9 = vsel %vm80_vm7, %v87_v62, %v89_v63  ;;  %v94_v10 = vsel %vm80_vm7, %v91_v0, %v93_v1 }
  0x91   :  { %v229_v11 = vshrl.u32 %v446_v35, %v525_v5  ;;  %v232_v12 = vshrl.u32 %v448_v41, %v525_v5  ;;  %v98_v14 = vand.u32 65535, %v94_v10  ;;  %v99_v16 = vshrl.u32 %v94_v10, 16 }
  0x92   :  { %v120_v18 = vand.u32 65535, %v90_v9  ;;  %v121_v19 = vshrl.u32 %v90_v9, 16  ;;  %v228_v20 = vshll.u32 %v445_v33, %v515_v60  ;;  %vm237_vm8 = vcmp.lt.s32.totalorder %v522_v4, 4 }
  0x93   :  { %v233_v21 = vor.u32 %v232_v12, %v231_v7  ;;  %v101_v22 = vmul.u32 %v99_v16, %v502_v31  ;;  %v542_v24 = vsel %vm80_vm7, %v83_v6, %v85_v8  ;;  %v102_v26 = vmul.u32 %v98_v14, %v97_v17 }
  0x94   :  { %v123_v27 = vmul.u32 %v121_v19, %v502_v31  ;;  %v210_v28 = vor.u32 8388608, %v520_v3  ;;  %v230_v30 = vor.u32 %v229_v11, %v228_v20  ;;  %v100_v34 = vmul.u32 %v98_v14, %v502_v31 }
  0x95   :  { %v103_v35 = vmul.u32 %v99_v16, %v97_v17  ;;  %v104_v36 = vshll.u32 %v101_v22, 16  ;;  %v247_v37 = vsel %vm237_vm8, %v233_v21, 1326507024  ;;  %v105_v39 = vshrl.u32 %v101_v22, 16 }
  0x96   :  { %v122_v40 = vmul.u32 %v120_v18, %v502_v31  ;;  %v124_v41 = vmul.u32 %v120_v18, %v97_v17  ;;  %v106_v29 = vshll.u32 %v102_v26, 16  ;;  %v126_v44 = vshll.u32 %v123_v27, 16 }
  0x97   :  { %vm108_vm9 = vc.u32 %v100_v34, %v104_v36  ;;  %v110_v42 = vadd.s32 %v104_v36, %v100_v34  ;;  %v107_v45 = vshrl.u32 %v102_v26, 16  ;;  %v125_v48 = vmul.u32 %v121_v19, %v97_v17 }
  0x98   :  { %v109_v46 = vsel %vm108_vm9, 1, %v443_v2  ;;  %v128_v49 = vshll.u32 %v124_v41, 16  ;;  %vm130_vm11 = vc.u32 %v122_v40, %v126_v44  ;;  %v132_v51 = vadd.s32 %v126_v44, %v122_v40 }
  0x99   :  { %v111_v50 = vadd.s32 %v109_v46, %v103_v35  ;;  %vm112_vm10 = vc.u32 %v110_v42, %v106_v29  ;;  %v131_v53 = vsel %vm130_vm11, 1, %v443_v2  ;;  %v219_v31 = vshll.u32 %v447_v38, %v515_v60 }
  0x9a   :  { %v113_v52 = vsel %vm112_vm10, 1, %v443_v2  ;;  %v220_v54 = vshrl.u32 %v449_v43, %v525_v5  ;;  %v127_v56 = vshrl.u32 %v123_v27, 16  ;;  %v133_v57 = vadd.s32 %v131_v53, %v125_v48 }
  0x9b   :  { %v115_v55 = vadd.s32 %v113_v52, %v111_v50  ;;  %vm134_vm12 = vc.u32 %v132_v51, %v128_v49  ;;  %v222_v61 = vshll.u32 %v449_v43, %v515_v60  ;;  %v223_v62 = vshrl.u32 %v450_v47, %v525_v5 }
  0x9c   :  { %v135_v58 = vsel %vm134_vm12, 1, %v443_v2  ;;  %v558_v59 = vor.u32 %v220_v54, %v219_v31  ;;  %v225_v1 = vshll.u32 %v450_v47, %v515_v60  ;;  %v226_v3 = vshrl.u32 %v445_v33, %v525_v5 }
  0x9d   :  { %v116_v63 = vadd.s32 %v115_v55, %v105_v39  ;;  %v137_v0 = vadd.s32 %v135_v58, %v133_v57  ;;  %v243_v6 = vsel %vm237_vm8, %v230_v30, 920167782  ;;  %v129_v7 = vshrl.u32 %v124_v41, 16 }
  0x9e   :  { %v570_v8 = vor.u32 %v223_v62, %v222_v61  ;;  %vm234_vm13 = vcmp.lt.s32.totalorder %v522_v4, 1  ;;  %v227_v10 = vor.u32 %v226_v3, %v225_v1  ;;  %vm236_vm14 = vcmp.lt.s32.totalorder %v522_v4, 3 }
  0x9f   :  { %v573_v43 = vadd.s32 %v116_v63, %v107_v45  ;;  %v138_v9 = vadd.s32 %v137_v0, %v127_v56  ;;  %v576_v11 = vadd.s32 %v132_v51, %v128_v49  ;;  %v248_v47 = vsel %vm236_vm14, %v230_v30, %v247_v37 }
  0xa0   :  { %v242_v33 = vsel %vm234_vm13, %v558_v59, %v570_v8  ;;  %v584_v60 = vshll.u32 %v210_v28, 8  ;;  %v140_v14 = vmul.u32 %v497_v25, %v542_v24  ;;  %vm235_vm0 = vcmp.lt.s32.totalorder %v522_v4, 2 }
  0xa1   :  { %v139_v12 = vadd.s32 %v138_v9, %v129_v7  ;;  %vm142_vm15 = vc.u32 %v573_v43, %v576_v11  ;;  %v244_v16 = vsel %vm236_vm14, %v227_v10, %v243_v6  ;;  %v246_v17 = vsel %vm234_vm13, %v570_v8, %v227_v10 }
  0xa2   :  { %v245_v19 = vsel %vm235_vm0, %v242_v33, %v244_v16  ;;  %v249_v20 = vsel %vm235_vm0, %v246_v17, %v248_v47  ;;  %v251_v25 = vand.u32 65535, %v584_v60  ;;  %v252_v21 = vshrl.u32 %v584_v60, 16 }
  0xa3   :  { %v143_v18 = vadd.s32 1, %v139_v12  ;;  %v253_v22 = vand.u32 65535, %v249_v20  ;;  %v254_v24 = vshrl.u32 %v249_v20, 16  ;;  %v275_v26 = vand.u32 65535, %v245_v19 }
  0xa4   :  { %v276_v28 = vshrl.u32 %v245_v19, 16  ;;  %v218_v62 = vshrl.u32 %v447_v38, %v525_v5  ;;  %v239_v63 = vsel %vm237_vm8, %v227_v10, 2102212464  ;;  %vm49_vm9 = vcmp.lt.s32.totalorder %v488_v13, 0 }
  0xa5   :  { %v144_v27 = vsel %vm142_vm15, %v143_v18, %v139_v12  ;;  %v256_v34 = vmul.u32 %v254_v24, %v251_v25  ;;  %v257_v35 = vmul.u32 %v253_v22, %v252_v21  ;;  %v279_v37 = vmul.u32 %v275_v26, %v252_v21 }
  0xa6   :  { %v145_v30 = vadd.s32 %v144_v27, %v140_v14  ;;  %v278_v36 = vmul.u32 %v276_v28, %v251_v25  ;;  %v255_v40 = vmul.u32 %v253_v22, %v251_v25  ;;  %v258_v29 = vmul.u32 %v254_v24, %v252_v21 }
  0xa7   :  { %v259_v41 = vshll.u32 %v256_v34, 16  ;;  %v277_v42 = vmul.u32 %v275_v26, %v251_v25  ;;  %v261_v46 = vshll.u32 %v257_v35, 16  ;;  %v283_v50 = vshll.u32 %v279_v37, 16 }
  0xa8   :  { %v146_v39 = vadd.s32 536870912, %v145_v30  ;;  %v281_v44 = vshll.u32 %v278_v36, 16  ;;  %v280_v31 = vmul.u32 %v276_v28, %v252_v21  ;;  %v260_v57 = vshrl.u32 %v256_v34, 16 }
  0xa9   :  { %vm263_vm1 = vc.u32 %v255_v40, %v259_v41  ;;  %v265_v48 = vadd.s32 %v259_v41, %v255_v40  ;;  %v262_v3 = vshrl.u32 %v257_v35, 16  ;;  %v282_v7 = vshrl.u32 %v278_v36, 16 }
  0xaa   :  { %v602_v45 = vshrl.u32 %v146_v39, 30  ;;  %v264_v49 = vsel %vm263_vm1, 1, %v443_v2  ;;  %vm285_vm2 = vc.u32 %v277_v42, %v281_v44  ;;  %v287_v51 = vadd.s32 %v281_v44, %v277_v42 }
  0xab   :  { %v266_v53 = vadd.s32 %v264_v49, %v258_v29  ;;  %vm267_vm3 = vc.u32 %v265_v48, %v261_v46  ;;  %v286_v55 = vsel %vm285_vm2, 1, %v443_v2  ;;  %v238_v47 = vsel %vm234_vm13, %v218_v62, %v558_v59 }
  0xac   :  { %v148_v52 = vshll.u32 %v602_v45, 30  ;;  %v268_v54 = vsel %vm267_vm3, 1, %v443_v2  ;;  %vm289_vm4 = vc.u32 %v287_v51, %v283_v50  ;;  %v288_v61 = vadd.s32 %v286_v55, %v280_v31 }
  0xad   :  { %v270_v58 = vadd.s32 %v268_v54, %v266_v53  ;;  %v290_v0 = vsel %vm289_vm4, 1, %v443_v2  ;;  %v240_v38 = vsel %vm236_vm14, %v570_v8, %v239_v63  ;;  %v284_v10 = vshrl.u32 %v279_v37, 16 }
  0xae   :  { %v149_v56 = vsub.s32 %v145_v30, %v148_v52  ;;  %v292_v9 = vadd.s32 %v290_v0, %v288_v61  ;;  %v291_v2 = vadd.s32 %v287_v51, %v283_v50  ;;  %v241_v17 = vsel %vm235_vm0, %v238_v47, %v240_v38 }
  0xaf   :  { %v271_v6 = vadd.s32 %v270_v58, %v260_v57  ;;  %v295_v59 = vmul.u32 %v584_v60, %v241_v17  ;;  %v141_v25 = vadd.s32 %v576_v11, %v573_v43  ;;  %vm630_vm10 = vcmp.le.f32.partialorder %v47_v15, 0.7853982 }
  0xb0   :  { %vm150_vm5 = vcmp.lt.s32.totalorder %v149_v56, 0  ;;  %v151_v1 = vsub.s32 0, %v149_v56  ;;  %v293_v14 = vadd.s32 %v292_v9, %v282_v7  ;;  %v171_v48 = vsub.s32 4, %v602_v45 }
  0xb1   :  { %v272_v5 = vadd.s32 %v271_v6, %v262_v3  ;;  %vm204_vm14 = vcmp.lt.s32.totalorder %v494_v23, 0  ;;  %vm190_vm0 = vweird.f32 %v488_v13  ;;  %vm645_vm1 = vcmp.le.f32.partialorder %v202_v32, 0.7853982 }
  0xb2   :  { %v152_v33 = vsel %vm150_vm5, %v151_v1, %v149_v56  ;;  %v294_v18 = vadd.s32 %v293_v14, %v284_v10  ;;  %v172_v31 = vsel %vm49_vm9, %v171_v48, %v602_v45  ;;  %vm345_vm5 = vweird.f32 %v494_v23 }
  0xb3   :  { %v153_v12 = vclz %v152_v33  ;;  %vm297_vm6 = vc.u32 %v272_v5, %v291_v2  ;;  %v174_v61 = vsel %vm630_vm10, 0, %v172_v31 }
  0xb4   :  { %v298_v19 = vadd.s32 1, %v294_v18  ;;  %v191_v9 = vadd.s32 3, %v174_v61 }
  0xb5   :  { %v392_v16 = vadd.s32 4294967294, %v153_v12 }
  0xb6   :  { %v299_v22 = vsel %vm297_vm6, %v298_v19, %v294_v18  ;;  %v192_v14 = vand.u32 3, %v191_v9  ;;  %v412_v19 = vpop.permute.xlu1 %411 }
  0xb7   :  { %vm393_vm7 = vcmp.lt.s32.totalorder %v392_v16, 0  ;;  %v300_v24 = vadd.s32 %v299_v22, %v295_v59 }
  0xb8   :  { %v156_v20 = vsel %vm393_vm7, 0, %v392_v16  ;;  %vm194_vm12 = vcmp.eq.s32.totalorder %v192_v14, 0  ;;  %vm197_vm13 = vcmp.eq.s32.totalorder %v192_v14, 2  ;;  %vm193_vm15 = vcmp.lt.s32.totalorder %v192_v14, 2 }
  0xb9   :  { %v157_v8 = vsub.s32 32, %v156_v20  ;;  %v161_v21 = vsub.s32 4294967266, %v156_v20  ;;  %v158_v26 = vshll.u32 %v149_v56, %v156_v20  ;;  %v301_v30 = vadd.s32 536870912, %v300_v24 }
  0xba   :  { %v296_v56 = vadd.s32 %v291_v2, %v272_v5 }
  0xbb   :  { %v159_v27 = vshrl.u32 %v141_v25, %v157_v8  ;;  %v162_v28 = vadd.s32 127, %v161_v21  ;;  %v624_v35 = vshrl.u32 %v301_v30, 30  ;;  %v413_v8 = vunpack.i.l.bf16 %v412_v19 }
  0xbd   :  { %v160_v4 = vor.u32 %v159_v27, %v158_v26  ;;  %v163_v34 = vshll.u32 %v162_v28, 23  ;;  %v303_v37 = vshll.u32 %v624_v35, 30  ;;  %v326_v30 = vsub.s32 4, %v624_v35 }
  0xbf   :  { %v164_v36 = vor.u32 4788187, %v163_v34  ;;  %v167_v60 = vcvt.s32.f32 %v160_v4  ;;  %v304_v40 = vsub.s32 %v300_v24, %v303_v37  ;;  %v327_v32 = vsel %vm204_vm14, %v326_v30, %v624_v35 }
  0xc0   :  { %v414_v35 = vunpack.i.h.bf16 %v412_v19 }
  0xc1   :  { %v165_v39 = vand.u32 2147483647, %v164_v36  ;;  %vm305_vm8 = vcmp.lt.s32.totalorder %v304_v40, 0  ;;  %v306_v43 = vsub.s32 0, %v304_v40 }
  0xc3   :  { %v168_v41 = vmul.f32 %v167_v60, %v165_v39  ;;  %v307_v29 = vsel %vm305_vm8, %v306_v43, %v304_v40 }
  0xc4   :  { %v308_v46 = vclz %v307_v29 }
  0xc5   :  { %v169_v11 = vxor.u32 2147483648, %v168_v41 }
  0xc6   :  { %v395_v51 = vadd.s32 4294967294, %v308_v46 }
  0xc7   :  { %v170_v44 = vsel %vm49_vm9, %v169_v11, %v168_v41 }
  0xc8   :  { %v173_v49 = vsel %vm630_vm10, %v488_v13, %v170_v44  ;;  %vm396_vm11 = vcmp.lt.s32.totalorder %v395_v51, 0 }
  0xc9   :  { %v175_v50 = vmul.f32 %v173_v49, %v173_v49  ;;  %v311_v54 = vsel %vm396_vm11, 0, %v395_v51 }
  0xca   :  { %v312_v57 = vsub.s32 32, %v311_v54  ;;  %v316_v58 = vsub.s32 4294967266, %v311_v54  ;;  %v313_v1 = vshll.u32 %v304_v40, %v311_v54  ;;  %v329_v40 = vsel %vm645_vm1, 0, %v327_v32 }
  0xcb   :  { %v176_v52 = vmul.f32 -0.001358992, %v175_v50  ;;  %v183_v53 = vmul.f32 -0.00019511016, %v175_v50  ;;  %v346_v42 = vadd.s32 3, %v329_v40 }
  0xcc   :  { %v314_v0 = vshrl.u32 %v296_v56, %v312_v57  ;;  %v317_v3 = vadd.s32 127, %v316_v58 }
  0xcd   :  { %v177_v15 = vadd.f32 0.041655596, %v176_v52  ;;  %v184_v55 = vadd.f32 0.008332121, %v183_v53 }
  0xce   :  { %v315_v33 = vor.u32 %v314_v0, %v313_v1  ;;  %v318_v47 = vshll.u32 %v317_v3, 23 }
  0xcf   :  { %v178_v62 = vmul.f32 %v177_v15, %v175_v50  ;;  %v185_v63 = vmul.f32 %v184_v55, %v175_v50 }
  0xd0   :  { %v319_v12 = vor.u32 4788187, %v318_v47  ;;  %v322_v16 = vcvt.s32.f32 %v315_v33 }
  0xd1   :  { %v179_v6 = vadd.f32 -0.4999988, %v178_v62  ;;  %v186_v7 = vadd.f32 -0.16666654, %v185_v63 }
  0xd2   :  { %v320_v2 = vand.u32 2147483647, %v319_v12 }
  0xd3   :  { %v180_v45 = vmul.f32 %v179_v6, %v175_v50  ;;  %v187_v38 = vmul.f32 %v186_v7, %v175_v50  ;;  %v347_v50 = vand.u32 3, %v346_v42 }
  0xd4   :  { %v323_v20 = vmul.f32 %v322_v16, %v320_v2 }
  0xd5   :  { %v181_v10 = vadd.f32 1.0, %v180_v45  ;;  %v188_v5 = vadd.f32 1.0, %v187_v38  ;;  %vm349_vm2 = vcmp.eq.s32.totalorder %v347_v50, 0  ;;  %vm352_vm3 = vcmp.eq.s32.totalorder %v347_v50, 2 }
  0xd6   :  { %v324_v25 = vxor.u32 2147483648, %v323_v20  ;;  %vm348_vm4 = vcmp.lt.s32.totalorder %v347_v50, 2 }
  0xd7   :  { %v189_v17 = vmul.f32 %v188_v5, %v173_v49  ;;  %v198_v18 = vxor.u32 2147483648, %v181_v10 }
  0xd8   :  { %v325_v27 = vsel %vm204_vm14, %v324_v25, %v323_v20 }
  0xd9   :  { %v195_v59 = vxor.u32 2147483648, %v189_v17  ;;  %v199_v22 = vsel %vm197_vm13, %v198_v18, %v189_v17  ;;  %v328_v4 = vsel %vm645_vm1, %v494_v23, %v325_v27 }
  0xda   :  { %v330_v34 = vmul.f32 %v328_v4, %v328_v4 }
  0xdb   :  { %v196_v21 = vsel %vm194_vm12, %v181_v10, %v195_v59 }
  0xdc   :  { %v200_v24 = vsel %vm193_vm15, %v196_v21, %v199_v22  ;;  %v331_v13 = vmul.f32 -0.001358992, %v330_v34  ;;  %v338_v37 = vmul.f32 -0.00019511016, %v330_v34 }
  0xdd   :  { %v201_v28 = vsel %vm190_vm0, nan, %v200_v24 }
  0xde   :  { %v367_v36 = vmul.f32 %v413_v8, %v201_v28  ;;  %v332_v39 = vadd.f32 0.041655596, %v331_v13  ;;  %v339_v60 = vadd.f32 0.008332121, %v338_v37 }
  0xe0   :  { %369 = vst [vmem:[#allocation2] sm:$0xff] %v367_v36  ;;  %v333_v41 = vmul.f32 %v332_v39, %v330_v34  ;;  %v340_v43 = vmul.f32 %v339_v60, %v330_v34 }
  0xe2   :  { %v334_v11 = vadd.f32 -0.4999988, %v333_v41  ;;  %v341_v29 = vadd.f32 -0.16666654, %v340_v43 }
  0xe4   :  { %v335_v44 = vmul.f32 %v334_v11, %v330_v34  ;;  %v342_v46 = vmul.f32 %v341_v29, %v330_v34 }
  0xe6   :  { %v336_v48 = vadd.f32 1.0, %v335_v44  ;;  %v343_v49 = vadd.f32 1.0, %v342_v46 }
  0xe8   :  { %v344_v51 = vmul.f32 %v343_v49, %v328_v4  ;;  %v353_v52 = vxor.u32 2147483648, %v336_v48 }
  0xea   :  { %v350_v53 = vxor.u32 2147483648, %v344_v51  ;;  %v354_v54 = vsel %vm352_vm3, %v353_v52, %v344_v51 }
  0xec   :  { %v351_v31 = vsel %vm349_vm2, %v336_v48, %v350_v53 }
  0xed   :  { %v355_v15 = vsel %vm348_vm4, %v351_v31, %v354_v54 }
  0xee   :  { %v356_v55 = vsel %vm345_vm5, nan, %v355_v15 }
  0xef   :  { %v368_v56 = vmul.f32 %v414_v35, %v356_v55 }
  0xf1   :  { %370 = vst [vmem:[#allocation2 + $0x8] sm:$0xff] %v368_v56 }
  0xf2   :  { %383 = dma.vmem_to_hbm [thread:$0]  %s376_s2, 256, %s378_s21, [#allocation3], %s452_s22, %s452_s22, %s453_s23  }
  0xf3   :  { %441 = dma.done.wait [#allocation3], 256  }
  0xf4   :  { %442 = vsyncadd [#allocation3], 4294967040 }
  0xf5   :  { %388 = vsyncpa [#allocation3], 1 }

</bundles_post_ra>
